<compile_context>
chip_gen: v7x
topology: tpu7x:2x2x1
jax: 0.10.0
libtpu: 0.0.40
codegen_flags: <defaults>
</compile_context>

<pallas_src>
import functools

import numpy as np
import jax
import jax.numpy as jnp
from jax.experimental import pallas as pl
from jax.experimental.pallas import tpu as pltpu


# Per-input-block DMA budget. Review guidance: ~6-8 MiB (v6e/v7x), ~4 MiB (v5e).
# 6 MiB double-buffered (+ small output buffers) stays under every generation's
# scoped-VMEM ceiling once vmem_limit_bytes is set explicitly below.
_BLOCK_BUDGET_BYTES = 6 << 20
# Below this many pixels the fused XLA argmax wins on fixed dispatch overhead.
_PALLAS_MIN_PIXELS = 64 * 1024


def _argmax_kernel(x_ref, o_ref, *, chunk_rows, nan_aware):
    """Channel argmax over a (C, tile_rows, 128) lane-dense spatial tile.

    The tile is processed in `chunk_rows`-row chunks (a few vregs), channel
    loop innermost, so best_val / best_idx stay resident in vregs across the
    channel compare/select stream instead of bouncing through VMEM.
    """
    c_dim = x_ref.shape[0]
    n_chunks = x_ref.shape[1] // chunk_rows      # exact: wrapper guarantees it

    @pl.loop(0, n_chunks)
    def _(r):
        row0 = pl.multiple_of(r * chunk_rows, chunk_rows)
        best_val = x_ref[0, pl.ds(row0, chunk_rows), :]
        best_idx = jnp.zeros(best_val.shape, dtype=jnp.int32)
        for ch in range(1, c_dim):                       # C is small & static
            xc = x_ref[ch, pl.ds(row0, chunk_rows), :]
            take = xc > best_val                         # strict '>' => first
            if nan_aware:                                # occurrence wins ties
                # argmax treats NaN as maximal (first NaN wins) — match it.
                take = take | (jnp.isnan(xc) & ~jnp.isnan(best_val))
            best_idx = jnp.where(take, jnp.int32(ch), best_idx)
            best_val = jnp.where(take, xc, best_val)
        o_ref[pl.ds(row0, chunk_rows), :] = best_idx.astype(o_ref.dtype)


def _choose_tiling(c, hw, itemsize):
    """Lane-dense tiling: rows of 128 pixels, dtype-aware sublane rounding."""
    pack = max(8, 32 // itemsize)          # packed sublanes: 8 f32/16 bf16/32 i8
    chunk_rows = 4 * pack                  # in-kernel vreg-resident chunk
    rows_needed = -(-hw // 128)
    per_row_bytes = c * 128 * itemsize
    max_rows = max(chunk_rows,
                   (_BLOCK_BUDGET_BYTES // per_row_bytes) // chunk_rows * chunk_rows)
    num_tiles = -(-rows_needed // max_rows)
    # Keep >= 2 grid steps when there is enough work: lets the "parallel" axis
    # shard across v7x's two TensorCores (near-free extra step on v5e/v6e).
    if num_tiles == 1 and rows_needed > chunk_rows:
        num_tiles = 2
    # Minimise tail padding: smallest sublane-rounded tile covering rows_needed
    # in num_tiles steps (instead of padding up to a full budget-sized tile).
    tile_rows = -(-rows_needed // num_tiles)
    tile_rows = max(chunk_rows, -(-tile_rows // chunk_rows) * chunk_rows)
    return tile_rows, chunk_rows, num_tiles


@functools.partial(jax.jit, static_argnames=("idx",))
def _sample_pred(tensor, idx):
    """Channel argmax of tensor[idx] via the Pallas kernel (device result)."""
    n, c, h, w = tensor.shape
    hw = h * w
    itemsize = jnp.dtype(tensor.dtype).itemsize
    tile_rows, chunk_rows, num_tiles = _choose_tiling(c, hw, itemsize)
    out_dtype = jnp.int8 if c <= 127 else jnp.int32
    nan_aware = bool(jnp.issubdtype(tensor.dtype, jnp.floating))

    if hw % 128 == 0 and hw // 128 >= chunk_rows:
        # Zero-copy path: free bitcast reshape of the ORIGINAL batch buffer,
        # static idx baked into the index_map -> only tensor[idx]'s blocks are
        # ever DMA'd, no pad / no slice pass. Edge blocks may read past `rows`
        # (garbage); those results land in padded output rows and are sliced.
        rows = hw // 128
        x = tensor.reshape(n, c, rows, 128)
        grid_steps = -(-rows // tile_rows)
        in_spec = pl.BlockSpec((pl.Squeezed(), c, tile_rows, 128),
                               lambda s: (idx, 0, s, 0))
    else:
        # Pad path: slice the single sample first (pads C*H*W, never N*C*H*W).
        grid_steps = num_tiles
        rows_in = grid_steps * tile_rows
        x = tensor[idx].reshape(c, hw)
        pad = rows_in * 128 - hw
        if pad:
            x = jnp.pad(x, ((0, 0), (0, pad)))
        x = x.reshape(c, rows_in, 128)
        in_spec = pl.BlockSpec((c, tile_rows, 128), lambda s: (0, s, 0))

    out_rows = grid_steps * tile_rows
    in_block_bytes = c * tile_rows * 128 * itemsize
    out_block_bytes = tile_rows * 128 * jnp.dtype(out_dtype).itemsize
    vmem_limit = min(32 << 20,
                     max(16 << 20, int(2.5 * (in_block_bytes + out_block_bytes))))

    out = pl.pallas_call(
        functools.partial(_argmax_kernel, chunk_rows=chunk_rows,
                          nan_aware=nan_aware),
        out_shape=jax.ShapeDtypeStruct((out_rows, 128), out_dtype),
        grid=(grid_steps,),
        in_specs=[in_spec],
        # NOTE: sweep pipeline_mode=pl.Buffered(3) here if a trace shows
        # exposed DMA at step boundaries; default double-buffering is kept.
        out_specs=pl.BlockSpec((tile_rows, 128), lambda s: (s, 0)),
        compiler_params=pltpu.CompilerParams(
            dimension_semantics=("parallel",),
            vmem_limit_bytes=vmem_limit,
        ),
    )(x)
    return out.reshape(out_rows * 128)[:hw].reshape(h, w)


@functools.partial(jax.jit, static_argnames=("idx",))
def _argmax_xla(tensor, idx):
    # Fallback for small maps: argmax(softmax(x)) == argmax(x), softmax dropped.
    return jnp.argmax(tensor[idx], axis=0)


def sample_matrix(tensor, t_type, idx=0, use_pallas=None):
    """JAX/Pallas equivalent of SampleMatrix.forward (returns host numpy)."""
    if t_type == "pred":
        h, w = tensor.shape[2], tensor.shape[3]
        if use_pallas is None:
            use_pallas = (h * w) >= _PALLAS_MIN_PIXELS
        out = _sample_pred(tensor, idx=idx) if use_pallas else _argmax_xla(tensor, idx=idx)
        # torch.argmax returns int64 — widen the narrow device result on host.
        return np.asarray(jax.device_get(out), dtype=np.int64)
    elif t_type == "latent":
        # Pure slicing — no compute; stays as XLA/host glue (no kernel needed).
        return np.asarray(jax.device_get(tensor[idx, 0, :, :]))
    elif t_type == "gt":
        # Pure slicing — no compute; stays as XLA/host glue (no kernel needed).
        return np.asarray(jax.device_get(tensor[idx, :, :]))
    else:
        raise ValueError


if __name__ == "__main__":
    key = jax.random.PRNGKey(0)
    k1, k2, k3, k4, k5 = jax.random.split(key, 5)

    # Canonical small shape from the module: batch=2, channels=4, spatial=16.
    N, C, H, W = 2, 4, 16, 16
    pred_in = jax.random.normal(k1, (N, C, H, W), dtype=jnp.float32)
    latent_in = jax.random.normal(k2, (N, 1, H, W), dtype=jnp.float32)
    gt_in = jax.random.randint(k3, (N, H, W), 0, C).astype(jnp.int32)

    # Run the Pallas kernel once on-device and block on the result.
    dev_out = _sample_pred(pred_in, idx=1)
    jax.block_until_ready(dev_out)

    # 'pred' path — force the kernel at toy size (auto-dispatch would bypass).
    pred_mat = sample_matrix(pred_in, "pred", idx=1, use_pallas=True)
    ref = np.asarray(jax.device_get(
        jnp.argmax(jax.nn.softmax(pred_in, axis=1), axis=1)[1]))
    assert pred_mat.shape == (H, W) and pred_mat.dtype == np.int64
    assert (pred_mat == ref).all()

    # Auto-dispatch path (fused XLA argmax at this size) must agree.
    pred_auto = sample_matrix(pred_in, "pred", idx=1)
    assert (pred_auto == ref).all()

    # hw % 128 != 0 -> single-sample pad path.
    pred2 = jax.random.normal(k4, (2, 6, 50, 50), dtype=jnp.float32)
    got2 = sample_matrix(pred2, "pred", idx=0, use_pallas=True)
    ref2 = np.asarray(jax.device_get(jnp.argmax(pred2[0], axis=0)))
    assert (got2 == ref2).all()

    # hw % 128 == 0 -> zero-copy path (no slice, no pad), 2-step parallel grid,
    # f32 multi-tile with a partially-valid last input block.
    pred3 = jax.random.normal(k5, (2, 4, 144, 144), dtype=jnp.float32)
    got3 = sample_matrix(pred3, "pred", idx=1, use_pallas=True)
    ref3 = np.asarray(jax.device_get(jnp.argmax(pred3[1], axis=0)))
    assert (got3 == ref3).all()

    # bf16 input: 16-sublane packing, zero-copy path.
    pred4 = jax.random.normal(k1, (1, 5, 96, 96), dtype=jnp.bfloat16)
    got4 = sample_matrix(pred4, "pred", idx=0, use_pallas=True)
    ref4 = np.asarray(jax.device_get(jnp.argmax(pred4[0], axis=0)))
    assert (got4 == ref4).all()

    # 'latent' and 'gt' paths (pure slicing glue).
    lat_mat = sample_matrix(latent_in, "latent", idx=0)
    gt_mat = sample_matrix(gt_in, "gt", idx=0)
    assert lat_mat.shape == (H, W) and gt_mat.shape == (H, W)

    print("KERNEL_OK")
</pallas_src>

<mosaic_0001>
module attributes {stable_mosaic.version = 11 : i64} {
  func.func @_argmax_kernel(%arg0: i32, %arg1: memref<4x32x128xf32, #tpu.memory_space<vmem>>, %arg2: memref<32x128xi8, #tpu.memory_space<vmem>>) attributes {dimension_semantics = [#tpu.dimension_semantics<parallel>], iteration_bounds = array<i64: 1>, scalar_prefetch = 0 : i64, scratch_operands = 0 : i64, tpu.core_type = #tpu.core_type<tc>, window_params = [{transform_indices = @transform_0, window_bounds = array<i64: 4, 32, 128>}, {transform_indices = @transform_1, window_bounds = array<i64: 32, 128>}]} {
    %c0_i32 = arith.constant 0 : i32
    %c1_i32 = arith.constant 1 : i32
    %0 = arith.muli %c0_i32, %c1_i32 : i32
    %c0_i32_0 = arith.constant 0 : i32
    %1 = arith.addi %c0_i32_0, %0 : i32
    %c32_i32 = arith.constant 32 : i32
    %2 = arith.muli %1, %c32_i32 : i32
    %3 = tpu.assume_multiple %2, 32 : i32
    %c0 = arith.constant 0 : index
    %4 = arith.index_cast %3 : i32 to index
    %c0_1 = arith.constant 0 : index
    %5 = vector.load %arg1[%c0, %4, %c0_1] : memref<4x32x128xf32, #tpu.memory_space<vmem>>, vector<1x32x128xf32>
    %6 = vector.shape_cast %5 : vector<1x32x128xf32> to vector<32x128xf32>
    %c0_i32_2 = arith.constant 0 : i32
    %7 = vector.broadcast %c0_i32_2 : i32 to vector<32x128xi32>
    %c1 = arith.constant 1 : index
    %8 = arith.index_cast %3 : i32 to index
    %c0_3 = arith.constant 0 : index
    %9 = vector.load %arg1[%c1, %8, %c0_3] : memref<4x32x128xf32, #tpu.memory_space<vmem>>, vector<1x32x128xf32>
    %10 = vector.shape_cast %9 : vector<1x32x128xf32> to vector<32x128xf32>
    %11 = arith.cmpf ogt, %10, %6 : vector<32x128xf32>
    %12 = arith.cmpf one, %10, %10 : vector<32x128xf32>
    %13 = arith.cmpf one, %6, %6 : vector<32x128xf32>
    %cst = arith.constant dense<true> : vector<32x128xi1>
    %14 = arith.xori %13, %cst : vector<32x128xi1>
    %15 = arith.andi %12, %14 : vector<32x128xi1>
    %16 = arith.ori %11, %15 : vector<32x128xi1>
    %c1_i32_4 = arith.constant 1 : i32
    %17 = vector.broadcast %c1_i32_4 : i32 to vector<32x128xi32>
    %18 = arith.select %16, %17, %7 : vector<32x128xi1>, vector<32x128xi32>
    %19 = arith.select %16, %10, %6 : vector<32x128xi1>, vector<32x128xf32>
    %c2 = arith.constant 2 : index
    %20 = arith.index_cast %3 : i32 to index
    %c0_5 = arith.constant 0 : index
    %21 = vector.load %arg1[%c2, %20, %c0_5] : memref<4x32x128xf32, #tpu.memory_space<vmem>>, vector<1x32x128xf32>
    %22 = vector.shape_cast %21 : vector<1x32x128xf32> to vector<32x128xf32>
    %23 = arith.cmpf ogt, %22, %19 : vector<32x128xf32>
    %24 = arith.cmpf one, %22, %22 : vector<32x128xf32>
    %25 = arith.cmpf one, %19, %19 : vector<32x128xf32>
    %cst_6 = arith.constant dense<true> : vector<32x128xi1>
    %26 = arith.xori %25, %cst_6 : vector<32x128xi1>
    %27 = arith.andi %24, %26 : vector<32x128xi1>
    %28 = arith.ori %23, %27 : vector<32x128xi1>
    %c2_i32 = arith.constant 2 : i32
    %29 = vector.broadcast %c2_i32 : i32 to vector<32x128xi32>
    %30 = arith.select %28, %29, %18 : vector<32x128xi1>, vector<32x128xi32>
    %31 = arith.select %28, %22, %19 : vector<32x128xi1>, vector<32x128xf32>
    %c3 = arith.constant 3 : index
    %32 = arith.index_cast %3 : i32 to index
    %c0_7 = arith.constant 0 : index
    %33 = vector.load %arg1[%c3, %32, %c0_7] : memref<4x32x128xf32, #tpu.memory_space<vmem>>, vector<1x32x128xf32>
    %34 = vector.shape_cast %33 : vector<1x32x128xf32> to vector<32x128xf32>
    %35 = arith.cmpf ogt, %34, %31 : vector<32x128xf32>
    %36 = arith.cmpf one, %34, %34 : vector<32x128xf32>
    %37 = arith.cmpf one, %31, %31 : vector<32x128xf32>
    %cst_8 = arith.constant dense<true> : vector<32x128xi1>
    %38 = arith.xori %37, %cst_8 : vector<32x128xi1>
    %39 = arith.andi %36, %38 : vector<32x128xi1>
    %40 = arith.ori %35, %39 : vector<32x128xi1>
    %c3_i32 = arith.constant 3 : i32
    %41 = vector.broadcast %c3_i32 : i32 to vector<32x128xi32>
    %42 = arith.select %40, %41, %30 : vector<32x128xi1>, vector<32x128xi32>
    %43 = arith.trunci %42 : vector<32x128xi32> to vector<32x128xi8>
    %44 = arith.index_cast %3 : i32 to index
    %c0_9 = arith.constant 0 : index
    %45 = vector.load %arg2[%44, %c0_9] : memref<32x128xi8, #tpu.memory_space<vmem>>, vector<32x128xi8>
    tpu.vector_store %arg2[%44, %c0_9], %43 {strides = array<i32>} : memref<32x128xi8, #tpu.memory_space<vmem>>, vector<32x128xi8>,
    %c1_i32_10 = arith.constant 1 : i32
    return
  }
  func.func @transform_0(%arg0: i32) -> (i32, i32, i32) {
    %c0_i32 = arith.constant 0 : i32
    %c0_i32_0 = arith.constant 0 : i32
    %c0_i32_1 = arith.constant 0 : i32
    return %c0_i32, %arg0, %c0_i32_0 : i32, i32, i32
  }
  func.func @transform_1(%arg0: i32) -> (i32, i32) {
    %c0_i32 = arith.constant 0 : i32
    %c0_i32_0 = arith.constant 0 : i32
    return %arg0, %c0_i32 : i32, i32
  }
}

</mosaic_0001>

<bundles_post_ra>
// kernel: squeeze.1
= control target key start
LH: loop header
LB: loop body
LE: loop exit
PB: predicated region body
PF: predicated region fallthrough
CT: control target
= control target key end

     0   :  { %s15_s6 = smov 3  ;;  %s18_s7 = smov 12  ;;  %vm20_vm0 = vcmask 1043458   ;;  %vm25_vm1 = vcmask 1045508   ;;  %vm30_vm2 = vcmask 1047558   ;;  %vm4_vm3 = vcmask 1047556   ;;  %s364_s0 = inlined_call_operand.vmem [shape: f32[1,4,16,16], index: 0, kind: input, shape index: {}]   ;;  %s365_s1 = inlined_call_operand.vmem [shape: f32[4,256], index: 1, kind: output, shape index: {}]  }
   0x1   :  { %v193_v0 = vld [vmem:[%s364_s0 + $0x7] ss:$16 sm:%s15_s6]   ;;  %s23_s12 = smov 48  ;;  %s28_s13 = smov 192  ;;  %vm6_vm4 = vcmask 130048   ;;  %vm34_vm5 = vcmask 1048448  }
   0x2   :  { %v194_v1 = vld [vmem:[%s364_s0 + $0x7] ss:$16 sm:%s18_s7]   ;;  %v195_v3 = vld [vmem:[%s364_s0 - $0x31] ss:$16 sm:%s23_s12]   ;;  %s63_s18 = smov 3  ;;  %s66_s21 = smov 12 }
   0x3   :  { %v21_v2 = vsel %vm20_vm0, %v194_v1, %v193_v0  ;;  %v196_v4 = vld [vmem:[%s364_s0 - $0x31] ss:$16 sm:%s28_s13]   ;;  %v201_v6 = vld [vmem:[%s364_s0 + $0x5] ss:$16 sm:%s63_s18]   ;;  %s71_s22 = smov 48  ;;  %s76_s27 = smov 192 }
   0x4   :  { %v26_v5 = vsel %vm25_vm1, %v195_v3, %v21_v2  ;;  %v202_v8 = vld [vmem:[%s364_s0 + $0x5] ss:$16 sm:%s66_s21]   ;;  %v203_v9 = vld [vmem:[%s364_s0 - $0x33] ss:$16 sm:%s71_s22]   ;;  %s229_s28 = smov 112   ;;  %s39_s2 = smov 3 }
   0x5   :  { %v31_v7 = vsel %vm30_vm2, %v196_v4, %v26_v5  ;;  %v69_v10 = vsel %vm20_vm0, %v202_v8, %v201_v6  ;;  %v204_v11 = vld [vmem:[%s364_s0 - $0x33] ss:$16 sm:%s76_s27]   ;;  %s42_s3 = smov 12  ;;  %v197_v13 = vld [vmem:[%s364_s0 + $0x6] ss:$16 sm:%s39_s2]   ;;  %s47_s8 = smov 48 }
   0x6   :  { %32 = vrot.lane.b32.xlu0 %v31_v7, %s229_s28  ;;  %v74_v12 = vsel %vm25_vm1, %v203_v9, %v69_v10  ;;  %v198_v14 = vld [vmem:[%s364_s0 + $0x6] ss:$16 sm:%s42_s3]   ;;  %s52_s9 = smov 192  ;;  %s87_s14 = smov 3  ;;  %vm58_vm6 = vcmask 917248   ;;  %vm82_vm7 = vcmask 786048  }
   0x7   :  { %v79_v15 = vsel %vm30_vm2, %v204_v11, %v74_v12  ;;  %v45_v16 = vsel %vm20_vm0, %v198_v14, %v197_v13  ;;  %v199_v17 = vld [vmem:[%s364_s0 - $0x32] ss:$16 sm:%s47_s8]   ;;  %s230_s15 = smov 80   ;;  %v205_v20 = vld [vmem:[%s364_s0 + $0x4] ss:$16 sm:%s87_s14]   ;;  %s90_s18 = smov 12 }
   0x8   :  { %v200_v18 = vld [vmem:[%s364_s0 - $0x32] ss:$16 sm:%s52_s9]   ;;  %80 = vrot.lane.b32.xlu1 %v79_v15, %s230_s15  ;;  %v50_v19 = vsel %vm25_vm1, %v199_v17, %v45_v16  ;;  %s95_s19 = smov 48  ;;  %s100_s24 = smov 192  ;;  %vm106_vm8 = vcmask 654848   ;;  %vm130_vm9 = vcmask 523648  }
   0x9   :  { %v55_v21 = vsel %vm30_vm2, %v200_v18, %v50_v19  ;;  %v206_v22 = vld [vmem:[%s364_s0 + $0x4] ss:$16 sm:%s90_s18]   ;;  %v207_v23 = vld [vmem:[%s364_s0 - $0x34] ss:$16 sm:%s95_s19]   ;;  %s231_s25 = smov 96   ;;  %s111_s28 = smov 3 }
   0xa   :  { %56 = vrot.lane.b32.xlu0 %v55_v21, %s231_s25  ;;  %v93_v24 = vsel %vm20_vm0, %v206_v22, %v205_v20  ;;  %v208_v25 = vld [vmem:[%s364_s0 - $0x34] ss:$16 sm:%s100_s24]   ;;  %s114_s29 = smov 12  ;;  %s119_s5 = smov 48  ;;  %vm154_vm10 = vcmask 392448   ;;  %vm178_vm11 = vcmask 261248  }
   0xb   :  { %v98_v26 = vsel %vm25_vm1, %v207_v23, %v93_v24  ;;  %v209_v27 = vld [vmem:[%s364_s0 + $0x3] ss:$16 sm:%s111_s28]   ;;  %s124_s6 = smov 192  ;;  %v211_v31 = vld [vmem:[%s364_s0 - $0x35] ss:$16 sm:%s119_s5]   ;;  %s135_s11 = smov 3 }
   0xc   :  { %v210_v28 = vld [vmem:[%s364_s0 + $0x3] ss:$16 sm:%s114_s29]   ;;  %v103_v29 = vsel %vm30_vm2, %v208_v25, %v98_v26  ;;  %v212_v32 = vld [vmem:[%s364_s0 - $0x35] ss:$16 sm:%s124_s6]   ;;  %s232_s12 = smov 64   ;;  %s138_s15 = smov 12 }
   0xd   :  { %v117_v30 = vsel %vm20_vm0, %v210_v28, %v209_v27  ;;  %104 = vrot.lane.b32.xlu1 %v103_v29, %s232_s12  ;;  %v213_v34 = vld [vmem:[%s364_s0 + $0x2] ss:$16 sm:%s135_s11]   ;;  %s143_s16 = smov 48  ;;  %s148_s21 = smov 192 }
   0xe   :  { %v122_v33 = vsel %vm25_vm1, %v211_v31, %v117_v30  ;;  %v214_v36 = vld [vmem:[%s364_s0 + $0x2] ss:$16 sm:%s138_s15]   ;;  %v215_v37 = vld [vmem:[%s364_s0 - $0x36] ss:$16 sm:%s143_s16]   ;;  %s233_s22 = smov 48   ;;  %s159_s25 = smov 3 }
   0xf   :  { %v127_v35 = vsel %vm30_vm2, %v212_v32, %v122_v33  ;;  %v141_v38 = vsel %vm20_vm0, %v214_v36, %v213_v34  ;;  %v216_v39 = vld [vmem:[%s364_s0 - $0x36] ss:$16 sm:%s148_s21]   ;;  %s162_s26 = smov 12  ;;  %v217_v41 = vld [vmem:[%s364_s0 + $0x1] ss:$16 sm:%s159_s25]   ;;  %s167_s2 = smov 48 }
  0x10   :  { %128 = vrot.lane.b32.xlu0 %v127_v35, %s233_s22  ;;  %v146_v40 = vsel %vm25_vm1, %v215_v37, %v141_v38  ;;  %v218_v42 = vld [vmem:[%s364_s0 + $0x1] ss:$16 sm:%s162_s26]   ;;  %s172_s3 = smov 192  ;;  %s234_s8 = smov 32  }
  0x11   :  { %v151_v43 = vsel %vm30_vm2, %v216_v39, %v146_v40  ;;  %v165_v44 = vsel %vm20_vm0, %v218_v42, %v217_v41  ;;  %v219_v45 = vld [vmem:[%s364_s0 - $0x37] ss:$16 sm:%s167_s2]   ;;  %v2_v48 = vld [vmem:[%s364_s0] ss:$8 sm:$0xf]  }
  0x12   :  { %v220_v46 = vld [vmem:[%s364_s0 - $0x37] ss:$16 sm:%s172_s3]   ;;  %152 = vrot.lane.b32.xlu1 %v151_v43, %s234_s8  ;;  %v170_v47 = vsel %vm25_vm1, %v219_v45, %v165_v44  ;;  %v3_v49 = vld [vmem:[%s364_s0] ss:$8 sm:$0xf0]   ;;  %s235_s0 = smov 16  }
  0x13   :  { %v175_v50 = vsel %vm30_vm2, %v220_v46, %v170_v47  ;;  %v5_v51 = vsel %vm4_vm3, %v3_v49, %v2_v48 }
  0x14   :  { %176 = vrot.lane.b32.xlu0 %v175_v50, %s235_s0  ;;  %7 = vst.msk [vmem:[#allocation0] ss:$8 sm:$0x3] %vm6_vm4, %v5_v51   ;;  %9 = vst.msk [vmem:[#allocation0 - $0xf] ss:$8 sm:$0xc] %vm6_vm4, %v5_v51  }
  0x15   :  { %11 = vst.msk [vmem:[#allocation0 - $0x1e] ss:$8 sm:$0x30] %vm6_vm4, %v5_v51   ;;  %13 = vst.msk [vmem:[#allocation0 - $0x2d] ss:$8 sm:$0xc0] %vm6_vm4, %v5_v51  }
  0x78   :  { %v33_v52 = vpop.permute.xlu0 %32  }
  0x79   :  { %35 = vst.msk [vmem:[#allocation0] sm:$0xf] %vm34_vm5, %v33_v52   ;;  %37 = vst.msk [vmem:[#allocation0 + $0x4] sm:$0xf0] %vm34_vm5, %v33_v52  }
  0x7a   :  { %v81_v53 = vpop.permute.xlu1 %80  }
  0x7c   :  { %v57_v54 = vpop.permute.xlu0 %56  }
  0x7d   :  { %59 = vst.msk [vmem:[#allocation0] sm:$0xf] %vm58_vm6, %v57_v54   ;;  %61 = vst.msk [vmem:[#allocation0 + $0x4] sm:$0xf0] %vm58_vm6, %v57_v54  }
  0x7e   :  { %83 = vst.msk [vmem:[#allocation0] sm:$0xf] %vm82_vm7, %v81_v53   ;;  %85 = vst.msk [vmem:[#allocation0 + $0x4] sm:$0xf0] %vm82_vm7, %v81_v53  }
  0x7f   :  { %v105_v55 = vpop.permute.xlu1 %104  }
  0x80   :  { %107 = vst.msk [vmem:[#allocation0] sm:$0xf] %vm106_vm8, %v105_v55   ;;  %109 = vst.msk [vmem:[#allocation0 + $0x4] sm:$0xf0] %vm106_vm8, %v105_v55  }
  0x82   :  { %v129_v56 = vpop.permute.xlu0 %128  }
  0x83   :  { %131 = vst.msk [vmem:[#allocation0] sm:$0xf] %vm130_vm9, %v129_v56   ;;  %133 = vst.msk [vmem:[#allocation0 + $0x4] sm:$0xf0] %vm130_vm9, %v129_v56  }
  0x84   :  { %v153_v57 = vpop.permute.xlu1 %152  }
  0x85   :  { %155 = vst.msk [vmem:[#allocation0] sm:$0xf] %vm154_vm10, %v153_v57   ;;  %157 = vst.msk [vmem:[#allocation0 + $0x4] sm:$0xf0] %vm154_vm10, %v153_v57  }
  0x86   :  { %v177_v58 = vpop.permute.xlu0 %176  }
  0x87   :  { %179 = vst.msk [vmem:[#allocation0] sm:$0xf] %vm178_vm11, %v177_v58   ;;  %181 = vst.msk [vmem:[#allocation0 + $0x4] sm:$0xf0] %vm178_vm11, %v177_v58  }
  0x8e   :  { %v185_v59 = vld [vmem:[#allocation0] sm:$0xf]  ;;  %v189_v60 = vld [vmem:[#allocation0 + $0x8] sm:$0xf] }
  0x8f   :  { %187 = vst [vmem:[%s365_s1] sm:$0xf] %v185_v59  ;;  %221 = vst [vmem:[%s365_s1 + $0x4] sm:$0xf] %v189_v60 }

// kernel: _sample_pred.1
= control target key start
LH: loop header
LB: loop body
LE: loop exit
PB: predicated region body
PF: predicated region fallthrough
CT: control target
= control target key end

     0   :  { %vm155_vm3 = vmmov 1   ;;  %v156_v8 = vmov 0   ;;  %s289_s0 = inlined_call_operand.vmem [shape: f32[4,32,128], index: 0, kind: input, shape index: {}]   ;;  %s290_s1 = inlined_call_operand.vmem [shape: s8[32,128], index: 1, kind: output, shape index: {}]  }
   0x1   :  { %v8_v0 = vld [vmem:[%s289_s0] sm:$0xff]  ;;  %v9_v2 = vld [vmem:[%s289_s0 + $0x8] sm:$0xff]  ;;  %v10_v6 = vld [vmem:[%s289_s0 + $0x10] sm:$0xff] }
   0x2   :  { %v141_v1 = vld [vmem:[%s289_s0 + $0x20] sm:$0xff]  ;;  %vm26_vm2 = vcmp.ne.f32.partialorder %v8_v0, %v8_v0  ;;  %v142_v3 = vld [vmem:[%s289_s0 + $0x28] sm:$0xff]  ;;  %vm27_vm5 = vcmp.ne.f32.partialorder %v9_v2, %v9_v2  ;;  %v143_v17 = vld [vmem:[%s289_s0 + $0x30] sm:$0xff] }
   0x3   :  { %vm18_vm0 = vcmp.gt.f32.partialorder %v141_v1, %v8_v0  ;;  %vm22_vm1 = vcmp.ne.f32.partialorder %v141_v1, %v141_v1  ;;  %vm30_vm4 = vmxor %vm26_vm2, %vm155_vm3  ;;  %v145_v4 = vld [vmem:[%s289_s0 + $0x40] sm:$0xff]  ;;  %vm23_vm7 = vcmp.ne.f32.partialorder %v142_v3, %v142_v3  ;;  %vm19_vm15 = vcmp.gt.f32.partialorder %v142_v3, %v9_v2  ;;  %v146_v13 = vld [vmem:[%s289_s0 + $0x48] sm:$0xff] }
   0x4   :  { %vm34_vm6 = vmand %vm22_vm1, %vm30_vm4  ;;  %vm60_vm9 = vcmp.ne.f32.partialorder %v145_v4, %v145_v4  ;;  %v149_v7 = vld [vmem:[%s289_s0 + $0x60] sm:$0xff]  ;;  %v150_v19 = vld [vmem:[%s289_s0 + $0x68] sm:$0xff] }
   0x5   :  { %vm38_vm8 = vmor %vm18_vm0, %vm34_vm6  ;;  %vm28_vm0 = vcmp.ne.f32.partialorder %v10_v6, %v10_v6  ;;  %vm98_vm4 = vcmp.ne.f32.partialorder %v149_v7, %v149_v7  ;;  %v147_v25 = vld [vmem:[%s289_s0 + $0x50] sm:$0xff]  ;;  %v11_v29 = vld [vmem:[%s289_s0 + $0x18] sm:$0xff] }
   0x6   :  { %v46_v5 = vsel %vm38_vm8, %v141_v1, %v8_v0  ;;  %vm31_vm10 = vmxor %vm27_vm5, %vm155_vm3  ;;  %v42_v9 = vsel %vm38_vm8, 1, %v156_v8  ;;  %v144_v30 = vld [vmem:[%s289_s0 + $0x38] sm:$0xff]  ;;  %v151_v32 = vld [vmem:[%s289_s0 + $0x70] sm:$0xff] }
   0x7   :  { %vm56_vm11 = vcmp.gt.f32.partialorder %v145_v4, %v46_v5  ;;  %vm64_vm12 = vcmp.ne.f32.partialorder %v46_v5, %v46_v5  ;;  %vm35_vm13 = vmand %vm23_vm7, %vm31_vm10  ;;  %v148_v39 = vld [vmem:[%s289_s0 + $0x58] sm:$0xff] }
   0x8   :  { %vm68_vm14 = vmxor %vm64_vm12, %vm155_vm3  ;;  %vm61_vm12 = vcmp.ne.f32.partialorder %v146_v13, %v146_v13  ;;  %v152_v44 = vld [vmem:[%s289_s0 + $0x78] sm:$0xff] }
   0x9   :  { %vm72_vm1 = vmand %vm60_vm9, %vm68_vm14 }
   0xa   :  { %vm192_vm2 = vmor %vm56_vm11, %vm72_vm1  ;;  %vm24_vm1 = vcmp.ne.f32.partialorder %v143_v17, %v143_v17 }
   0xb   :  { %v84_v11 = vsel %vm192_vm2, %v145_v4, %v46_v5  ;;  %vm198_vm5 = vmor %vm19_vm15, %vm35_vm13  ;;  %v80_v16 = vsel %vm192_vm2, 2, %v42_v9  ;;  %vm20_vm2 = vcmp.gt.f32.partialorder %v143_v17, %v10_v6 }
   0xc   :  { %vm94_vm6 = vcmp.gt.f32.partialorder %v149_v7, %v84_v11  ;;  %vm102_vm7 = vcmp.ne.f32.partialorder %v84_v11, %v84_v11  ;;  %v47_v14 = vsel %vm198_vm5, %v142_v3, %v9_v2  ;;  %vm208_vm8 = vmxor %vm28_vm0, %vm155_vm3  ;;  %v43_v21 = vsel %vm198_vm5, 1, %v156_v8 }
   0xd   :  { %vm106_vm9 = vmxor %vm102_vm7, %vm155_vm3  ;;  %vm65_vm10 = vcmp.ne.f32.partialorder %v47_v14, %v47_v14  ;;  %vm57_vm14 = vcmp.gt.f32.partialorder %v146_v13, %v47_v14 }
   0xe   :  { %vm110_vm11 = vmand %vm98_vm4, %vm106_vm9  ;;  %vm99_vm4 = vcmp.ne.f32.partialorder %v150_v19, %v150_v19 }
   0xf   :  { %vm114_vm13 = vmor %vm94_vm6, %vm110_vm11 }
  0x10   :  { %v118_v18 = vsel %vm114_vm13, 3, %v80_v16  ;;  %vm69_vm15 = vmxor %vm65_vm10, %vm155_vm3 }
  0x11   :  { %v122_v20 = vpack.c.b16 %v118_v18, %v118_v18  ;;  %vm73_vm0 = vmand %vm61_vm12, %vm69_vm15  ;;  %vm62_vm12 = vcmp.ne.f32.partialorder %v147_v25, %v147_v25 }
  0x12   :  { %vm225_vm7 = vmor %vm57_vm14, %vm73_vm0  ;;  %vm29_vm0 = vcmp.ne.f32.partialorder %v11_v29, %v11_v29 }
  0x13   :  { %v123_v23 = vpack.c.b8 %v122_v20, %v122_v20  ;;  %v85_v24 = vsel %vm225_vm7, %v146_v13, %v47_v14  ;;  %vm36_vm6 = vmand %vm24_vm1, %vm208_vm8  ;;  %v81_v27 = vsel %vm225_vm7, 2, %v43_v21  ;;  %vm25_vm7 = vcmp.ne.f32.partialorder %v144_v30, %v144_v30 }
  0x14   :  { %vm95_vm9 = vcmp.gt.f32.partialorder %v150_v19, %v85_v24  ;;  %vm103_vm10 = vcmp.ne.f32.partialorder %v85_v24, %v85_v24  ;;  %vm236_vm11 = vmor %vm20_vm2, %vm36_vm6  ;;  %vm100_vm6 = vcmp.ne.f32.partialorder %v151_v32, %v151_v32 }
  0x15   :  { %130 = vst [vmem:[%s290_s1] sm:$0x3] %v123_v23  ;;  %vm107_vm5 = vmxor %vm103_vm10, %vm155_vm3  ;;  %v48_v28 = vsel %vm236_vm11, %v143_v17, %v10_v6  ;;  %v44_v34 = vsel %vm236_vm11, 1, %v156_v8 }
  0x16   :  { %vm111_vm8 = vmand %vm99_vm4, %vm107_vm5  ;;  %vm66_vm13 = vcmp.ne.f32.partialorder %v48_v28, %v48_v28  ;;  %vm58_vm15 = vcmp.gt.f32.partialorder %v147_v25, %v48_v28 }
  0x17   :  { %vm115_vm14 = vmor %vm95_vm9, %vm111_vm8 }
  0x18   :  { %v119_v31 = vsel %vm115_vm14, 3, %v81_v27  ;;  %vm70_vm1 = vmxor %vm66_vm13, %vm155_vm3 }
  0x19   :  { %v124_v33 = vpack.c.b16 %v119_v31, %v119_v31  ;;  %vm74_vm2 = vmand %vm62_vm12, %vm70_vm1  ;;  %vm21_vm12 = vcmp.gt.f32.partialorder %v144_v30, %v11_v29  ;;  %vm63_vm1 = vcmp.ne.f32.partialorder %v148_v39, %v148_v39 }
  0x1a   :  { %vm261_vm4 = vmor %vm58_vm15, %vm74_vm2 }
  0x1b   :  { %v125_v36 = vpack.c.b8 %v124_v33, %v124_v33  ;;  %v86_v37 = vsel %vm261_vm4, %v147_v25, %v48_v28  ;;  %vm33_vm9 = vmxor %vm29_vm0, %vm155_vm3  ;;  %v82_v38 = vsel %vm261_vm4, 2, %v44_v34 }
  0x1c   :  { %vm96_vm10 = vcmp.gt.f32.partialorder %v151_v32, %v86_v37  ;;  %vm104_vm5 = vcmp.ne.f32.partialorder %v86_v37, %v86_v37  ;;  %vm37_vm8 = vmand %vm25_vm7, %vm33_vm9  ;;  %vm101_vm9 = vcmp.ne.f32.partialorder %v152_v44, %v152_v44 }
  0x1d   :  { %131 = vst [vmem:[%s290_s1 + $0x2] sm:$0x3] %v125_v36  ;;  %vm108_vm11 = vmxor %vm104_vm5, %vm155_vm3 }
  0x1e   :  { %vm112_vm13 = vmand %vm100_vm6, %vm108_vm11 }
  0x1f   :  { %vm116_vm14 = vmor %vm96_vm10, %vm112_vm13 }
  0x20   :  { %v120_v40 = vsel %vm116_vm14, 3, %v82_v38  ;;  %vm41_vm15 = vmor %vm21_vm12, %vm37_vm8 }
  0x21   :  { %v126_v41 = vpack.c.b16 %v120_v40, %v120_v40  ;;  %v49_v42 = vsel %vm41_vm15, %v144_v30, %v11_v29  ;;  %v45_v45 = vsel %vm41_vm15, 1, %v156_v8 }
  0x22   :  { %vm59_vm0 = vcmp.gt.f32.partialorder %v148_v39, %v49_v42  ;;  %vm67_vm2 = vcmp.ne.f32.partialorder %v49_v42, %v49_v42 }
  0x23   :  { %v127_v43 = vpack.c.b8 %v126_v41, %v126_v41  ;;  %vm71_vm7 = vmxor %vm67_vm2, %vm155_vm3 }
  0x24   :  { %vm75_vm4 = vmand %vm63_vm1, %vm71_vm7 }
  0x25   :  { %132 = vst [vmem:[%s290_s1 + $0x4] sm:$0x3] %v127_v43  ;;  %vm79_vm6 = vmor %vm59_vm0, %vm75_vm4 }
  0x26   :  { %v87_v46 = vsel %vm79_vm6, %v148_v39, %v49_v42  ;;  %v83_v47 = vsel %vm79_vm6, 2, %v45_v45 }
  0x27   :  { %vm97_vm10 = vcmp.gt.f32.partialorder %v152_v44, %v87_v46  ;;  %vm105_vm5 = vcmp.ne.f32.partialorder %v87_v46, %v87_v46 }
  0x28   :  { %vm109_vm8 = vmxor %vm105_vm5, %vm155_vm3 }
  0x29   :  { %vm113_vm11 = vmand %vm101_vm9, %vm109_vm8 }
  0x2a   :  { %vm117_vm12 = vmor %vm97_vm10, %vm113_vm11 }
  0x2b   :  { %v121_v48 = vsel %vm117_vm12, 3, %v83_v47 }
  0x2c   :  { %v128_v49 = vpack.c.b16 %v121_v48, %v121_v48 }
  0x2e   :  { %v129_v50 = vpack.c.b8 %v128_v49, %v128_v49 }
  0x30   :  { %133 = vst [vmem:[%s290_s1 + $0x6] sm:$0x3] %v129_v50 }

</bundles_post_ra>
